<compile_context>
chip_gen: v5e
topology: v5e:2x2
jax: 0.10.0
libtpu: 0.0.40
codegen_flags: <defaults>
</compile_context>

<pallas_src>
import functools

import jax
import jax.numpy as jnp
import numpy as np
from jax.experimental import pallas as pl
from jax.experimental.pallas import tpu as pltpu


def _cdiv(a, b):
    return -(-a // b)


def _round_up(a, m):
    return _cdiv(a, m) * m


def _div_enc_kernel(x_ref, w1_ref, b1_ref, ggw_ref, g_ref, wsum_ref, beff_ref,
                    o_ref, *, hidden, n_groups):
    # Block shapes (F = batch-fold factor, NG = F*q groups per folded row):
    #   x_ref:   (Bt, F*q*v)        w1_ref: (F*q*v, F*q*H)   b1_ref:  (1, F*q*H)
    #   ggw_ref: (F*q*H, 2*NG)      g_ref:  (F*q*H, NG)
    #   wsum_ref / beff_ref: (1, NG)                          o_ref:   (Bt, NG)
    x = x_ref[...]

    # 1) All F*q per-head Linear(v, H) in one MXU pass via the block-diagonal weight.
    h = jnp.dot(x, w1_ref[...], preferred_element_type=jnp.float32) + b1_ref[...]

    # 2) ELU (alpha = 1).  exp goes to the EUP slot; compute stays f32.
    # TODO(synk): switch to an expm1-on-clamped-input form before adding a VJP (inf*0 -> NaN grads).
    h = jnp.where(h > 0.0, h, jnp.exp(h) - 1.0)                        # (Bt, F*q*H) f32

    # 3) Group reductions: red = [sum(h) | sum(h*w_eff)] per group, sq = sum(h^2) per group.
    red = jnp.dot(h.astype(ggw_ref.dtype), ggw_ref[...],
                  preferred_element_type=jnp.float32)                  # (Bt, 2*NG)
    sq = jnp.dot((h * h).astype(g_ref.dtype), g_ref[...],
                 preferred_element_type=jnp.float32)                   # (Bt, NG)

    inv_h = jnp.float32(1.0 / hidden)
    mean = red[:, :n_groups] * inv_h                                   # (Bt, NG)
    p = red[:, n_groups:]                                              # (Bt, NG)
    var = jnp.maximum(sq * inv_h - mean * mean, 0.0)                   # clamp cancellation
    inv_std = jax.lax.rsqrt(var + 1e-5)

    # 4) Folded LayerNorm-affine + Linear(H, 1):  out = inv_std*(P - mean*Wsum) + b_eff.
    o_ref[...] = inv_std * (p - mean * wsum_ref[...]) + beff_ref[...]  # (Bt, NG)


def pack_params(params, q, v, *, fold=2, mxu_dtype=jnp.bfloat16):
    """One-time (numpy) packing of the stacked per-head weights.  Call once at load time."""
    H = params["w1"].shape[-1]
    QV, QH = q * v, q * H
    NG = fold * q

    w1 = np.asarray(params["w1"], np.float32)                    # (q, v, H)
    b1 = np.asarray(params["b1"], np.float32).reshape(q, H)
    gamma = np.asarray(params["gamma"], np.float32).reshape(q, H)
    beta = np.asarray(params["beta"], np.float32).reshape(q, H)
    w2 = np.asarray(params["w2"], np.float32)[..., 0]            # (q, H)
    b2 = np.asarray(params["b2"], np.float32).reshape(q)

    # Fold LN affine + final Linear(H,1): y@w2 = hn@(gamma*w2) + sum(beta*w2) + b2.
    w_eff = gamma * w2                                           # (q, H)
    b_eff = (beta * w2).sum(-1) + b2                             # (q,)
    wsum = w_eff.sum(-1)                                         # (q,)

    # Block-diagonal first-layer weight over fold*q blocks of (v, H).
    w1_bd = np.zeros((fold * QV, fold * QH), np.float32)
    for s in range(fold):
        for i in range(q):
            w1_bd[s * QV + i * v:s * QV + (i + 1) * v,
                  s * QH + i * H:s * QH + (i + 1) * H] = w1[i]
    b1_fold = np.tile(b1.reshape(1, QH), (1, fold))              # (1, fold*QH)

    # Group indicator G[k, j] = 1 iff hidden column k belongs to (sample s, head i), j = s*q+i.
    head_of_col = np.arange(fold * QH) // H
    G = (head_of_col[:, None] == np.arange(NG)[None, :]).astype(np.float32)   # (fold*QH, NG)
    w_eff_fold = np.tile(w_eff.reshape(QH), fold)                              # (fold*QH,)
    Gw = G * w_eff_fold[:, None]
    GGw = np.concatenate([G, Gw], axis=1)                                      # (fold*QH, 2*NG)

    return {
        "w1": jnp.asarray(w1_bd, mxu_dtype),
        "b1": jnp.asarray(b1_fold, jnp.float32),
        "ggw": jnp.asarray(GGw, mxu_dtype),
        "g": jnp.asarray(G, mxu_dtype),
        "wsum": jnp.asarray(np.tile(wsum, fold).reshape(1, NG), jnp.float32),
        "beff": jnp.asarray(np.tile(b_eff, fold).reshape(1, NG), jnp.float32),
        "q": q, "v": v, "H": H, "fold": fold,
    }


def div_enc_layer(x, packed, *, b_tile_max=2048):
    """x: (B, q*v) f32.  packed: output of pack_params.  Returns (B, q) f32."""
    q, v, H, fold = packed["q"], packed["v"], packed["H"], packed["fold"]
    B = x.shape[0]
    QV = q * v
    NG = fold * q
    assert x.shape[1] == QV
    mxu_dtype = packed["w1"].dtype

    # ---- batch tiling over folded rows (fold batch rows share one lane-row) ----
    rows = _cdiv(B, fold)
    # >= 4 grid steps when the batch allows (v7x megacore), tile a multiple of 8 sublanes,
    # capped so double-buffered x + the f32 hidden slab stay well inside scoped VMEM.
    bt = max(8, min(b_tile_max, _round_up(_cdiv(rows, 4), 8)))
    n_tiles = _cdiv(rows, bt)
    rows_pad = n_tiles * bt
    B_pad = rows_pad * fold

    x_p = x.astype(mxu_dtype)
    if B_pad != B:
        x_p = jnp.pad(x_p, ((0, B_pad - B), (0, 0)))
    x_p = x_p.reshape(rows_pad, fold * QV)          # fold batch rows onto lanes (free reshape)

    kernel = functools.partial(_div_enc_kernel, hidden=H, n_groups=NG)
    out = pl.pallas_call(
        kernel,
        out_shape=jax.ShapeDtypeStruct((rows_pad, NG), jnp.float32),
        grid=(n_tiles,),
        in_specs=[
            pl.BlockSpec((bt, fold * QV), lambda i: (i, 0)),        # x tile (lane-dense)
            pl.BlockSpec((fold * QV, fold * q * H), lambda i: (0, 0)),  # block-diag W1 (resident)
            pl.BlockSpec((1, fold * q * H), lambda i: (0, 0)),      # b1 (resident)
            pl.BlockSpec((fold * q * H, 2 * NG), lambda i: (0, 0)), # [G | G*w_eff] (resident)
            pl.BlockSpec((fold * q * H, NG), lambda i: (0, 0)),     # G (resident)
            pl.BlockSpec((1, NG), lambda i: (0, 0)),                # Wsum (resident)
            pl.BlockSpec((1, NG), lambda i: (0, 0)),                # b_eff (resident)
        ],
        out_specs=pl.BlockSpec((bt, NG), lambda i: (i, 0)),
        compiler_params=pltpu.CompilerParams(
            dimension_semantics=("parallel",),
            vmem_limit_bytes=32 << 20,
        ),
    )(x_p, packed["w1"], packed["b1"], packed["ggw"], packed["g"],
      packed["wsum"], packed["beff"])

    return out.reshape(rows_pad * fold, q)[:B]


def make_params(key, q, v, unit_dim=(32, 1)):
    H, O = unit_dim
    assert O == 1
    k1, k2, k3, k4 = jax.random.split(key, 4)
    # Deterministic synthetic init (not a checkpoint load).
    w1 = jax.random.normal(k1, (q, v, H), jnp.float32) * (1.0 / np.sqrt(v))
    b1 = jax.random.normal(k2, (q, 1, H), jnp.float32) * 0.01
    gamma = jnp.ones((q, 1, H), jnp.float32)
    beta = jnp.zeros((q, 1, H), jnp.float32)
    w2 = jax.random.normal(k3, (q, H, O), jnp.float32) * (1.0 / np.sqrt(H))
    b2 = jax.random.normal(k4, (q, 1, O), jnp.float32) * 0.01
    return {"w1": w1, "b1": b1, "gamma": gamma, "beta": beta, "w2": w2, "b2": b2}


def _reference(x, params, q, v):
    """Pure-JAX reference replicating the PyTorch forward."""
    B = x.shape[0]
    xs = x.reshape(B, q, v)
    outs = []
    for i in range(q):
        h = xs[:, i, :] @ params["w1"][i] + params["b1"][i]
        h = jnp.where(h > 0.0, h, jnp.exp(h) - 1.0)
        mean = jnp.mean(h, axis=-1, keepdims=True)
        var = jnp.mean((h - mean) ** 2, axis=-1, keepdims=True)
        h = (h - mean) / jnp.sqrt(var + 1e-5)
        h = h * params["gamma"][i] + params["beta"][i]
        outs.append(h @ params["w2"][i] + params["b2"][i])
    return jnp.concatenate(outs, axis=1)


if __name__ == "__main__":
    q, v = 4, 16          # q heads, each fed a length-v slice
    unit_dim = (32, 1)

    key = jax.random.PRNGKey(0)
    kx, kp, kx2 = jax.random.split(key, 3)
    params = make_params(kp, q, v, unit_dim)

    # ---- f32 MXU-operand path: exact check against the reference ----
    packed_f32 = pack_params(params, q, v, mxu_dtype=jnp.float32)

    # Case 1: small batch -> single fused grid step.
    B = 8
    x = jax.random.normal(kx, (B, q * v), jnp.float32)
    out = jax.block_until_ready(div_enc_layer(x, packed_f32))
    ref = _reference(x, params, q, v)
    np.testing.assert_allclose(np.asarray(out), np.asarray(ref), rtol=2e-4, atol=2e-4)

    # Case 2: batch not a multiple of the (folded) tile -> exercises padding + multi-step grid.
    B2 = 20
    x2 = jax.random.normal(kx2, (B2, q * v), jnp.float32)
    out2 = jax.block_until_ready(div_enc_layer(x2, packed_f32, b_tile_max=8))
    ref2 = _reference(x2, params, q, v)
    np.testing.assert_allclose(np.asarray(out2), np.asarray(ref2), rtol=2e-4, atol=2e-4)

    # ---- bf16 MXU-operand path (perf default for v6e/v7x): looser tolerance ----
    packed_bf16 = pack_params(params, q, v, mxu_dtype=jnp.bfloat16)
    out3 = jax.block_until_ready(div_enc_layer(x2, packed_bf16))
    np.testing.assert_allclose(np.asarray(out3), np.asarray(ref2), rtol=5e-2, atol=5e-2)

    print("KERNEL_OK")
</pallas_src>

<mosaic_0001>
module attributes {stable_mosaic.version = 11 : i64} {
  func.func @_div_enc_kernel(%arg0: i32, %arg1: memref<8x128xf32, #tpu.memory_space<vmem>>, %arg2: memref<128x256xf32, #tpu.memory_space<vmem>>, %arg3: memref<1x256xf32, #tpu.memory_space<vmem>>, %arg4: memref<256x16xf32, #tpu.memory_space<vmem>>, %arg5: memref<256x8xf32, #tpu.memory_space<vmem>>, %arg6: memref<1x8xf32, #tpu.memory_space<vmem>>, %arg7: memref<1x8xf32, #tpu.memory_space<vmem>>, %arg8: memref<8x8xf32, #tpu.memory_space<vmem>>) attributes {dimension_semantics = [#tpu.dimension_semantics<parallel>], iteration_bounds = array<i64: 1>, scalar_prefetch = 0 : i64, scratch_operands = 0 : i64, tpu.core_type = #tpu.core_type<tc>, window_params = [{transform_indices = @transform_0, window_bounds = array<i64: 8, 128>}, {pipeline_mode = #tpu.pipeline_mode<synchronous>, transform_indices = @transform_1, window_bounds = array<i64: 128, 256>}, {pipeline_mode = #tpu.pipeline_mode<synchronous>, transform_indices = @transform_2, window_bounds = array<i64: 1, 256>}, {pipeline_mode = #tpu.pipeline_mode<synchronous>, transform_indices = @transform_3, window_bounds = array<i64: 256, 16>}, {pipeline_mode = #tpu.pipeline_mode<synchronous>, transform_indices = @transform_4, window_bounds = array<i64: 256, 8>}, {pipeline_mode = #tpu.pipeline_mode<synchronous>, transform_indices = @transform_5, window_bounds = array<i64: 1, 8>}, {pipeline_mode = #tpu.pipeline_mode<synchronous>, transform_indices = @transform_6, window_bounds = array<i64: 1, 8>}, {transform_indices = @transform_7, window_bounds = array<i64: 8, 8>}]} {
    %c0 = arith.constant 0 : index
    %c0_0 = arith.constant 0 : index
    %0 = vector.load %arg1[%c0, %c0_0] : memref<8x128xf32, #tpu.memory_space<vmem>>, vector<8x128xf32>
    %c0_1 = arith.constant 0 : index
    %c0_2 = arith.constant 0 : index
    %1 = vector.load %arg2[%c0_1, %c0_2] : memref<128x256xf32, #tpu.memory_space<vmem>>, vector<128x256xf32>
    %cst = arith.constant dense<0.000000e+00> : vector<8x256xf32>
    %2 = tpu.matmul %0, %1, %cst {dimension_numbers = #tpu.dot_dimension_numbers<[1], [0], [0], [1], [0, 0, 1, 1], [], []>} : vector<8x128xf32>, vector<128x256xf32>, vector<8x256xf32> -> vector<8x256xf32>
    %c0_3 = arith.constant 0 : index
    %c0_4 = arith.constant 0 : index
    %3 = vector.load %arg3[%c0_3, %c0_4] : memref<1x256xf32, #tpu.memory_space<vmem>>, vector<1x256xf32>
    %4 = vector.broadcast %3 : vector<1x256xf32> to vector<8x256xf32>
    %5 = arith.addf %2, %4 : vector<8x256xf32>
    %cst_5 = arith.constant 0.000000e+00 : f32
    %6 = vector.broadcast %cst_5 : f32 to vector<8x256xf32>
    %7 = arith.cmpf ogt, %5, %6 : vector<8x256xf32>
    %8 = math.exp %5 : vector<8x256xf32>
    %cst_6 = arith.constant 1.000000e+00 : f32
    %9 = vector.broadcast %cst_6 : f32 to vector<8x256xf32>
    %10 = arith.subf %8, %9 : vector<8x256xf32>
    %11 = arith.select %7, %5, %10 : vector<8x256xi1>, vector<8x256xf32>
    %c0_7 = arith.constant 0 : index
    %c0_8 = arith.constant 0 : index
    %12 = vector.load %arg4[%c0_7, %c0_8] : memref<256x16xf32, #tpu.memory_space<vmem>>, vector<256x16xf32>
    %cst_9 = arith.constant dense<0.000000e+00> : vector<8x16xf32>
    %13 = tpu.matmul %11, %12, %cst_9 {dimension_numbers = #tpu.dot_dimension_numbers<[1], [0], [0], [1], [0, 0, 1, 1], [], []>} : vector<8x256xf32>, vector<256x16xf32>, vector<8x16xf32> -> vector<8x16xf32>
    %14 = arith.mulf %11, %11 : vector<8x256xf32>
    %c0_10 = arith.constant 0 : index
    %c0_11 = arith.constant 0 : index
    %15 = vector.load %arg5[%c0_10, %c0_11] : memref<256x8xf32, #tpu.memory_space<vmem>>, vector<256x8xf32>
    %cst_12 = arith.constant dense<0.000000e+00> : vector<8x8xf32>
    %16 = tpu.matmul %14, %15, %cst_12 {dimension_numbers = #tpu.dot_dimension_numbers<[1], [0], [0], [1], [0, 0, 1, 1], [], []>} : vector<8x256xf32>, vector<256x8xf32>, vector<8x8xf32> -> vector<8x8xf32>
    %17 = vector.extract_strided_slice %13 {offsets = [0, 0], sizes = [8, 8], strides = [1, 1]} : vector<8x16xf32> to vector<8x8xf32>
    %cst_13 = arith.constant 3.125000e-02 : f32
    %18 = vector.broadcast %cst_13 : f32 to vector<8x8xf32>
    %19 = arith.mulf %17, %18 : vector<8x8xf32>
    %20 = vector.extract_strided_slice %13 {offsets = [0, 8], sizes = [8, 8], strides = [1, 1]} : vector<8x16xf32> to vector<8x8xf32>
    %cst_14 = arith.constant 3.125000e-02 : f32
    %21 = vector.broadcast %cst_14 : f32 to vector<8x8xf32>
    %22 = arith.mulf %16, %21 : vector<8x8xf32>
    %23 = arith.mulf %19, %19 : vector<8x8xf32>
    %24 = arith.subf %22, %23 : vector<8x8xf32>
    %cst_15 = arith.constant 0.000000e+00 : f32
    %25 = vector.broadcast %cst_15 : f32 to vector<8x8xf32>
    %26 = arith.maximumf %24, %25 : vector<8x8xf32>
    %cst_16 = arith.constant 9.99999974E-6 : f32
    %27 = vector.broadcast %cst_16 : f32 to vector<8x8xf32>
    %28 = arith.addf %26, %27 : vector<8x8xf32>
    %29 = math.rsqrt %28 : vector<8x8xf32>
    %c0_17 = arith.constant 0 : index
    %c0_18 = arith.constant 0 : index
    %30 = vector.load %arg6[%c0_17, %c0_18] : memref<1x8xf32, #tpu.memory_space<vmem>>, vector<1x8xf32>
    %31 = vector.broadcast %30 : vector<1x8xf32> to vector<8x8xf32>
    %32 = arith.mulf %19, %31 : vector<8x8xf32>
    %33 = arith.subf %20, %32 : vector<8x8xf32>
    %34 = arith.mulf %29, %33 : vector<8x8xf32>
    %c0_19 = arith.constant 0 : index
    %c0_20 = arith.constant 0 : index
    %35 = vector.load %arg7[%c0_19, %c0_20] : memref<1x8xf32, #tpu.memory_space<vmem>>, vector<1x8xf32>
    %36 = vector.broadcast %35 : vector<1x8xf32> to vector<8x8xf32>
    %37 = arith.addf %34, %36 : vector<8x8xf32>
    %c0_21 = arith.constant 0 : index
    %c0_22 = arith.constant 0 : index
    %38 = vector.load %arg8[%c0_21, %c0_22] : memref<8x8xf32, #tpu.memory_space<vmem>>, vector<8x8xf32>
    tpu.vector_store %arg8[%c0_21, %c0_22], %37 {strides = array<i32>} : memref<8x8xf32, #tpu.memory_space<vmem>>, vector<8x8xf32>,
    return
  }
  func.func @transform_0(%arg0: i32) -> (i32, i32) {
    %c0_i32 = arith.constant 0 : i32
    %c0_i32_0 = arith.constant 0 : i32
    return %arg0, %c0_i32 : i32, i32
  }
  func.func @transform_1(%arg0: i32) -> (i32, i32) {
    %c0_i32 = arith.constant 0 : i32
    %c0_i32_0 = arith.constant 0 : i32
    %c0_i32_1 = arith.constant 0 : i32
    return %c0_i32, %c0_i32_0 : i32, i32
  }
  func.func @transform_2(%arg0: i32) -> (i32, i32) {
    %c0_i32 = arith.constant 0 : i32
    %c0_i32_0 = arith.constant 0 : i32
    %c0_i32_1 = arith.constant 0 : i32
    return %c0_i32, %c0_i32_0 : i32, i32
  }
  func.func @transform_3(%arg0: i32) -> (i32, i32) {
    %c0_i32 = arith.constant 0 : i32
    %c0_i32_0 = arith.constant 0 : i32
    %c0_i32_1 = arith.constant 0 : i32
    return %c0_i32, %c0_i32_0 : i32, i32
  }
  func.func @transform_4(%arg0: i32) -> (i32, i32) {
    %c0_i32 = arith.constant 0 : i32
    %c0_i32_0 = arith.constant 0 : i32
    %c0_i32_1 = arith.constant 0 : i32
    return %c0_i32, %c0_i32_0 : i32, i32
  }
  func.func @transform_5(%arg0: i32) -> (i32, i32) {
    %c0_i32 = arith.constant 0 : i32
    %c0_i32_0 = arith.constant 0 : i32
    %c0_i32_1 = arith.constant 0 : i32
    return %c0_i32, %c0_i32_0 : i32, i32
  }
  func.func @transform_6(%arg0: i32) -> (i32, i32) {
    %c0_i32 = arith.constant 0 : i32
    %c0_i32_0 = arith.constant 0 : i32
    %c0_i32_1 = arith.constant 0 : i32
    return %c0_i32, %c0_i32_0 : i32, i32
  }
  func.func @transform_7(%arg0: i32) -> (i32, i32) {
    %c0_i32 = arith.constant 0 : i32
    %c0_i32_0 = arith.constant 0 : i32
    return %arg0, %c0_i32 : i32, i32
  }
}

</mosaic_0001>

<bundles_post_ra>
// kernel: tpu_custom_call.1
= control target key start
LH: loop header
LB: loop body
LE: loop exit
PB: predicated region body
PF: predicated region fallthrough
CT: control target
= control target key end

     0   :  { %s701_s0 = inlined_call_operand.vmem [shape: f32[8,128], index: 0, kind: input, shape index: {}]   ;;  %s702_s1 = inlined_call_operand.vmem [shape: f32[128,256], index: 1, kind: input, shape index: {}]   ;;  %s703_s2 = inlined_call_operand.vmem [shape: f32[1,256], index: 2, kind: input, shape index: {}]   ;;  %s704_s3 = inlined_call_operand.vmem [shape: f32[256,16], index: 3, kind: input, shape index: {}]   ;;  %s705_s4 = inlined_call_operand.vmem [shape: f32[256,8], index: 4, kind: input, shape index: {}]   ;;  %s706_s5 = inlined_call_operand.vmem [shape: f32[1,8], index: 5, kind: input, shape index: {}]   ;;  %s707_s6 = inlined_call_operand.vmem [shape: f32[1,8], index: 6, kind: input, shape index: {}]   ;;  %s708_s7 = inlined_call_operand.hbm [shape: f32[8,8], index: 7, kind: output, shape index: {}]  }
   0x1   :  { %v58_v0 = vld [vmem:[%s702_s1 + $0xf0] sm:$0xff]  ;;  %v59_v1 = vld [vmem:[%s702_s1 + $0xf8] sm:$0xff]  ;;  %v56_v2 = vld [vmem:[%s702_s1 + $0xe0] sm:$0xff] }
   0x2   :  { %66 = vmatpush.msra.mxu0 %v58_v0  ;;  %86 = vmatpush.msra.mxu1 %v59_v1  ;;  %v57_v3 = vld [vmem:[%s702_s1 + $0xe8] sm:$0xff]  ;;  %v54_v4 = vld [vmem:[%s702_s1 + $0xd0] sm:$0xff]  ;;  %v55_v5 = vld [vmem:[%s702_s1 + $0xd8] sm:$0xff] }
   0x3   :  { %v52_v6 = vld [vmem:[%s702_s1 + $0xc0] sm:$0xff]  ;;  %v53_v7 = vld [vmem:[%s702_s1 + $0xc8] sm:$0xff]  ;;  %v50_v8 = vld [vmem:[%s702_s1 + $0xb0] sm:$0xff] }
   0x4   :  { %67 = vmatpush.msra.mxu0 %v56_v2  ;;  %87 = vmatpush.msra.mxu1 %v57_v3  ;;  %v51_v9 = vld [vmem:[%s702_s1 + $0xb8] sm:$0xff]  ;;  %v48_v10 = vld [vmem:[%s702_s1 + $0xa0] sm:$0xff]  ;;  %v49_v11 = vld [vmem:[%s702_s1 + $0xa8] sm:$0xff] }
   0x5   :  { %v46_v12 = vld [vmem:[%s702_s1 + $0x90] sm:$0xff]  ;;  %v47_v13 = vld [vmem:[%s702_s1 + $0x98] sm:$0xff]  ;;  %v44_v17 = vld [vmem:[%s702_s1 + $0x80] sm:$0xff] }
   0x6   :  { %68 = vmatpush.msra.mxu0 %v54_v4  ;;  %88 = vmatpush.msra.mxu1 %v55_v5  ;;  %v131_v14 = vld [vmem:[%s704_s3 + $0x78] sm:$0xff]  ;;  %v130_v16 = vld [vmem:[%s704_s3 + $0x70] sm:$0xff]  ;;  %v45_v18 = vld [vmem:[%s702_s1 + $0x88] sm:$0xff] }
   0x7   :  { %v147_v15 = vld [vmem:[%s704_s3 + $0xf8] sm:$0xff]  ;;  %148 = vmatpush.msra.mxu2 %v131_v14  ;;  %v146_v19 = vld [vmem:[%s704_s3 + $0xf0] sm:$0xff]  ;;  %v129_v20 = vld [vmem:[%s704_s3 + $0x68] sm:$0xff] }
   0x8   :  { %69 = vmatpush.msra.mxu0 %v52_v6  ;;  %89 = vmatpush.msra.mxu1 %v53_v7  ;;  %v145_v21 = vld [vmem:[%s704_s3 + $0xe8] sm:$0xff]  ;;  %v42_v22 = vld [vmem:[%s702_s1 + $0x70] sm:$0xff]  ;;  %v43_v23 = vld [vmem:[%s702_s1 + $0x78] sm:$0xff] }
   0x9   :  { %168 = vmatpush.msra.mxu3 %v147_v15  ;;  %149 = vmatpush.msra.mxu2 %v130_v16  ;;  %v128_v24 = vld [vmem:[%s704_s3 + $0x60] sm:$0xff]  ;;  %v41_v27 = vld [vmem:[%s702_s1 + $0x68] sm:$0xff]  ;;  %v127_v28 = vld [vmem:[%s704_s3 + $0x58] sm:$0xff] }
   0xa   :  { %70 = vmatpush.msra.mxu0 %v50_v8  ;;  %90 = vmatpush.msra.mxu1 %v51_v9  ;;  %v144_v25 = vld [vmem:[%s704_s3 + $0xe0] sm:$0xff]  ;;  %v143_v29 = vld [vmem:[%s704_s3 + $0xd8] sm:$0xff]  ;;  %v38_v30 = vld [vmem:[%s702_s1 + $0x50] sm:$0xff] }
   0xb   :  { %169 = vmatpush.msra.mxu3 %v146_v19  ;;  %v40_v26 = vld [vmem:[%s702_s1 + $0x60] sm:$0xff]  ;;  %150 = vmatpush.msra.mxu2 %v129_v20  ;;  %v39_v31 = vld [vmem:[%s702_s1 + $0x58] sm:$0xff]  ;;  %v126_v32 = vld [vmem:[%s704_s3 + $0x50] sm:$0xff] }
   0xc   :  { %71 = vmatpush.msra.mxu0 %v48_v10  ;;  %91 = vmatpush.msra.mxu1 %v49_v11  ;;  %v142_v33 = vld [vmem:[%s704_s3 + $0xd0] sm:$0xff]  ;;  %v36_v34 = vld [vmem:[%s702_s1 + $0x40] sm:$0xff]  ;;  %v37_v35 = vld [vmem:[%s702_s1 + $0x48] sm:$0xff] }
   0xd   :  { %170 = vmatpush.msra.mxu3 %v145_v21  ;;  %151 = vmatpush.msra.mxu2 %v128_v24  ;;  %v125_v36 = vld [vmem:[%s704_s3 + $0x48] sm:$0xff]  ;;  %v34_v38 = vld [vmem:[%s702_s1 + $0x30] sm:$0xff]  ;;  %v35_v39 = vld [vmem:[%s702_s1 + $0x38] sm:$0xff] }
   0xe   :  { %72 = vmatpush.msra.mxu0 %v46_v12  ;;  %92 = vmatpush.msra.mxu1 %v47_v13  ;;  %v141_v37 = vld [vmem:[%s704_s3 + $0xc8] sm:$0xff] }
   0xf   :  { %171 = vmatpush.msra.mxu3 %v144_v25  ;;  %152 = vmatpush.msra.mxu2 %v127_v28 }
  0x10   :  { %73 = vmatpush.msra.mxu0 %v44_v17  ;;  %93 = vmatpush.msra.mxu1 %v45_v18 }
  0x11   :  { %172 = vmatpush.msra.mxu3 %v143_v29  ;;  %153 = vmatpush.msra.mxu2 %v126_v32 }
  0x12   :  { %74 = vmatpush.msra.mxu0 %v42_v22  ;;  %94 = vmatpush.msra.mxu1 %v43_v23 }
  0x13   :  { %173 = vmatpush.msra.mxu3 %v142_v33 }
  0x14   :  { %75 = vmatpush.msra.mxu0 %v40_v26  ;;  %95 = vmatpush.msra.mxu1 %v41_v27 }
  0x16   :  { %76 = vmatpush.msra.mxu0 %v38_v30  ;;  %96 = vmatpush.msra.mxu1 %v39_v31 }
  0x17   :  { %12 = vsyncpa [#allocation3], 0  ;;  %v124_v40 = vld [vmem:[%s704_s3 + $0x40] sm:$0xff]  ;;  %v33_v43 = vld [vmem:[%s702_s1 + $0x28] sm:$0xff]  ;;  %154 = vmatpush.msra.mxu2 %v125_v36  ;;  %174 = vmatpush.msra.mxu3 %v141_v37  ;;  %s355_s27 = smov 8   ;;  %s356_s28 = smov 120  }
  0x18   :  { %77 = vmatpush.msra.mxu0 %v36_v34  ;;  %97 = vmatpush.msra.mxu1 %v37_v35  ;;  %v140_v41 = vld [vmem:[%s704_s3 + $0xc0] sm:$0xff]  ;;  %v30_v44 = vld [vmem:[%s702_s1 + $0x10] sm:$0xff]  ;;  %v31_v45 = vld [vmem:[%s702_s1 + $0x18] sm:$0xff]  ;;  %s357_s30 = smov [#allocation2]   ;;  %s307_s11 = sshll.u32 %s708_s7, 4  ;;  %vm298_vm5 = vcmask 64512   ;;  %s308_s11 = int_to_ptr.hbm [resolvable:$true] %s307_s11 }
  0x19   :  { %v32_v42 = vld [vmem:[%s702_s1 + $0x20] sm:$0xff]  ;;  %155 = vmatpush.msra.mxu2 %v124_v40  ;;  %175 = vmatpush.msra.mxu3 %v140_v41  ;;  %v29_v47 = vld [vmem:[%s702_s1 + $0x8] sm:$0xff]  ;;  %v205_v49 = vld [vmem:[%s705_s4 + $0x78] sm:$0xff]  ;;  %s305_s8 = sshll.u32 %s357_s30, 4  ;;  %s306_s8 = int_to_ptr.vmem [resolvable:$true] %s305_s8 }
  0x1a   :  { %78 = vmatpush.msra.mxu0 %v34_v38  ;;  %98 = vmatpush.msra.mxu1 %v35_v39  ;;  %v28_v46 = vld [vmem:[%s702_s1] sm:$0xff]  ;;  %v221_v50 = vld [vmem:[%s705_s4 + $0xf8] sm:$0xff]  ;;  %v204_v51 = vld [vmem:[%s705_s4 + $0x70] sm:$0xff] }
  0x1b   :  { %v27_v48 = vld [vmem:[%s701_s0] sm:$0xff]  ;;  %v220_v52 = vld [vmem:[%s705_s4 + $0xf0] sm:$0xff]  ;;  %v203_v53 = vld [vmem:[%s705_s4 + $0x68] sm:$0xff] }
  0x1c   :  { %79 = vmatpush.msra.mxu0 %v32_v42  ;;  %99 = vmatpush.msra.mxu1 %v33_v43  ;;  %v219_v54 = vld [vmem:[%s705_s4 + $0xe8] sm:$0xff]  ;;  %v202_v55 = vld [vmem:[%s705_s4 + $0x60] sm:$0xff]  ;;  %v201_v57 = vld [vmem:[%s705_s4 + $0x58] sm:$0xff] }
  0x1d   :  { %v218_v56 = vld [vmem:[%s705_s4 + $0xe0] sm:$0xff]  ;;  %v217_v58 = vld [vmem:[%s705_s4 + $0xd8] sm:$0xff]  ;;  %v200_v59 = vld [vmem:[%s705_s4 + $0x50] sm:$0xff] }
  0x1e   :  { %80 = vmatpush.msra.mxu0 %v30_v44  ;;  %100 = vmatpush.msra.mxu1 %v31_v45  ;;  %v216_v60 = vld [vmem:[%s705_s4 + $0xd0] sm:$0xff]  ;;  %v199_v61 = vld [vmem:[%s705_s4 + $0x48] sm:$0xff]  ;;  %v123_v63 = vld [vmem:[%s704_s3 + $0x38] sm:$0xff] }
  0x1f   :  { %v215_v62 = vld [vmem:[%s705_s4 + $0xc8] sm:$0xff]  ;;  %v139_v0 = vld [vmem:[%s704_s3 + $0xb8] sm:$0xff]  ;;  %v198_v1 = vld [vmem:[%s705_s4 + $0x40] sm:$0xff]  ;;  %156 = vmatpush.msra.mxu2 %v123_v63 }
  0x20   :  { %81 = vmatpush.msra.mxu0 %v28_v46  ;;  %101 = vmatpush.msra.mxu1 %v29_v47  ;;  %v214_v2 = vld [vmem:[%s705_s4 + $0xc0] sm:$0xff]  ;;  %v122_v3 = vld [vmem:[%s704_s3 + $0x30] sm:$0xff]  ;;  %v197_v5 = vld [vmem:[%s705_s4 + $0x38] sm:$0xff] }
  0x21   :  { %82 = vmatmul.f32.vlgmr.msra.gmra.mxu0 %v27_v48  ;;  %102 = vmatmul.f32.vlgmr.msra.gmra.mxu1 %v27_v48  ;;  %v138_v4 = vld [vmem:[%s704_s3 + $0xb0] sm:$0xff]  ;;  %v213_v6 = vld [vmem:[%s705_s4 + $0xb8] sm:$0xff]  ;;  %v121_v7 = vld [vmem:[%s704_s3 + $0x28] sm:$0xff] }
  0x22   :  { %222 = vmatpush.msrb.mxu0 %v205_v49  ;;  %242 = vmatpush.msrb.mxu1 %v221_v50  ;;  %v137_v8 = vld [vmem:[%s704_s3 + $0xa8] sm:$0xff]  ;;  %v196_v9 = vld [vmem:[%s705_s4 + $0x30] sm:$0xff]  ;;  %v120_v11 = vld [vmem:[%s704_s3 + $0x20] sm:$0xff] }
  0x23   :  { %176 = vmatpush.msra.mxu3 %v139_v0  ;;  %157 = vmatpush.msra.mxu2 %v122_v3  ;;  %v212_v10 = vld [vmem:[%s705_s4 + $0xb0] sm:$0xff]  ;;  %v136_v12 = vld [vmem:[%s704_s3 + $0xa0] sm:$0xff]  ;;  %v195_v13 = vld [vmem:[%s705_s4 + $0x28] sm:$0xff] }
  0x24   :  { %223 = vmatpush.msrb.mxu0 %v204_v51  ;;  %243 = vmatpush.msrb.mxu1 %v220_v52  ;;  %v211_v14 = vld [vmem:[%s705_s4 + $0xa8] sm:$0xff]  ;;  %v119_v15 = vld [vmem:[%s704_s3 + $0x18] sm:$0xff]  ;;  %v194_v17 = vld [vmem:[%s705_s4 + $0x20] sm:$0xff] }
  0x25   :  { %177 = vmatpush.msra.mxu3 %v138_v4  ;;  %158 = vmatpush.msra.mxu2 %v121_v7  ;;  %v135_v16 = vld [vmem:[%s704_s3 + $0x98] sm:$0xff]  ;;  %v210_v18 = vld [vmem:[%s705_s4 + $0xa0] sm:$0xff]  ;;  %v118_v19 = vld [vmem:[%s704_s3 + $0x10] sm:$0xff] }
  0x26   :  { %224 = vmatpush.msrb.mxu0 %v203_v53  ;;  %244 = vmatpush.msrb.mxu1 %v219_v54  ;;  %v134_v20 = vld [vmem:[%s704_s3 + $0x90] sm:$0xff]  ;;  %v193_v21 = vld [vmem:[%s705_s4 + $0x18] sm:$0xff]  ;;  %v117_v23 = vld [vmem:[%s704_s3 + $0x8] sm:$0xff] }
  0x27   :  { %178 = vmatpush.msra.mxu3 %v137_v8  ;;  %159 = vmatpush.msra.mxu2 %v120_v11  ;;  %v209_v22 = vld [vmem:[%s705_s4 + $0x98] sm:$0xff]  ;;  %v133_v24 = vld [vmem:[%s704_s3 + $0x88] sm:$0xff]  ;;  %v192_v25 = vld [vmem:[%s705_s4 + $0x10] sm:$0xff] }
  0x28   :  { %225 = vmatpush.msrb.mxu0 %v202_v55  ;;  %245 = vmatpush.msrb.mxu1 %v218_v56  ;;  %v208_v26 = vld [vmem:[%s705_s4 + $0x90] sm:$0xff]  ;;  %v116_v27 = vld [vmem:[%s704_s3] sm:$0xff]  ;;  %v191_v29 = vld [vmem:[%s705_s4 + $0x8] sm:$0xff] }
  0x29   :  { %179 = vmatpush.msra.mxu3 %v136_v12  ;;  %160 = vmatpush.msra.mxu2 %v119_v15  ;;  %v132_v28 = vld [vmem:[%s704_s3 + $0x80] sm:$0xff]  ;;  %v207_v30 = vld [vmem:[%s705_s4 + $0x88] sm:$0xff] }
  0x2a   :  { %226 = vmatpush.msrb.mxu0 %v201_v57  ;;  %246 = vmatpush.msrb.mxu1 %v217_v58  ;;  %v190_v31 = vld [vmem:[%s705_s4] sm:$0xff] }
  0x2b   :  { %180 = vmatpush.msra.mxu3 %v135_v16  ;;  %161 = vmatpush.msra.mxu2 %v118_v19  ;;  %v206_v32 = vld [vmem:[%s705_s4 + $0x80] sm:$0xff] }
  0x2c   :  { %227 = vmatpush.msrb.mxu0 %v200_v59  ;;  %247 = vmatpush.msrb.mxu1 %v216_v60  ;;  %v60_v33 = vld [vmem:[%s703_s2] sm:$0x3] }
  0x2d   :  { %181 = vmatpush.msra.mxu3 %v134_v20  ;;  %162 = vmatpush.msra.mxu2 %v117_v23  ;;  %v62_v34 = vperm.slane %v60_v33, 0  ;;  %v63_v35 = vperm.slane %v60_v33, 1  ;;  %v321_v53 = vld [vmem:[%s706_s5] ss:$0 sm:$0xff] }
  0x2e   :  { %228 = vmatpush.msrb.mxu0 %v199_v61  ;;  %248 = vmatpush.msrb.mxu1 %v215_v62  ;;  %v322_v8 = vld [vmem:[%s707_s6] ss:$0 sm:$0xff] }
  0x2f   :  { %182 = vmatpush.msra.mxu3 %v133_v24  ;;  %163 = vmatpush.msra.mxu2 %v116_v27 }
  0x30   :  { %229 = vmatpush.msrb.mxu0 %v198_v1  ;;  %249 = vmatpush.msrb.mxu1 %v214_v2 }
  0x31   :  { %183 = vmatpush.msra.mxu3 %v132_v28 }
  0x32   :  { %230 = vmatpush.msrb.mxu0 %v197_v5  ;;  %250 = vmatpush.msrb.mxu1 %v213_v6 }
  0x34   :  { %231 = vmatpush.msrb.mxu0 %v196_v9  ;;  %251 = vmatpush.msrb.mxu1 %v212_v10 }
  0x36   :  { %232 = vmatpush.msrb.mxu0 %v195_v13  ;;  %252 = vmatpush.msrb.mxu1 %v211_v14 }
  0x38   :  { %233 = vmatpush.msrb.mxu0 %v194_v17  ;;  %253 = vmatpush.msrb.mxu1 %v210_v18 }
  0x3a   :  { %234 = vmatpush.msrb.mxu0 %v193_v21  ;;  %254 = vmatpush.msrb.mxu1 %v209_v22 }
  0x3c   :  { %235 = vmatpush.msrb.mxu0 %v192_v25  ;;  %255 = vmatpush.msrb.mxu1 %v208_v26 }
  0x3e   :  { %236 = vmatpush.msrb.mxu0 %v191_v29  ;;  %256 = vmatpush.msrb.mxu1 %v207_v30 }
  0x40   :  { %237 = vmatpush.msrb.mxu0 %v190_v31  ;;  %257 = vmatpush.msrb.mxu1 %v206_v32 }
  0x9e   :  { %v83_v36 = vpop.f32.mrf.mxu0  ;;  %v103_v37 = vpop.f32.mrf.mxu1 }
  0x9f   :  { %v84_v38 = vadd.f32 %v83_v36, %v62_v34  ;;  %v104_v39 = vadd.f32 %v103_v37, %v63_v35 }
  0xa1   :  { %v108_v40 = vmul.f32 1.442695, %v84_v38  ;;  %v110_v41 = vmul.f32 1.442695, %v104_v39  ;;  %vm106_vm0 = vcmp.gt.f32.partialorder %v84_v38, 0.0  ;;  %vm107_vm1 = vcmp.gt.f32.partialorder %v104_v39, 0.0 }
  0xa3   :  { %323 = vpow2.f32 %v108_v40 }
  0xa4   :  { %325 = vpow2.f32 %v110_v41 }
  0xa9   :  { %v324_v42 = vpop.eup %323 }
  0xaa   :  { %v326_v43 = vpop.eup %325  ;;  %v316_v44 = vadd.f32 -1.0, %v324_v42 }
  0xab   :  { %v317_v45 = vadd.f32 -1.0, %v326_v43 }
  0xac   :  { %v114_v46 = vsel %vm106_vm0, %v84_v38, %v316_v44 }
  0xad   :  { %164 = vmatmul.f32.vlgmr.msra.gmra.mxu2 %v114_v46  ;;  %v188_v47 = vmul.f32 %v114_v46, %v114_v46  ;;  %v115_v48 = vsel %vm107_vm1, %v104_v39, %v317_v45 }
  0xae   :  { %184 = vmatmul.f32.vlgmr.msra.gmra.mxu3 %v115_v48  ;;  %v189_v49 = vmul.f32 %v115_v48, %v115_v48 }
  0xaf   :  { %238 = vmatmul.f32.vlgmr.msrb.gmra.mxu0 %v188_v47 }
  0xb0   :  { %258 = vmatmul.f32.vlgmr.msrb.gmra.mxu1 %v189_v49 }
 0x12c   :  { %v239_v58 = vpop.f32.mrf.mxu0 }
 0x12d   :  { %v259_v59 = vpop.f32.mrf.mxu1 }
 0x12e   :  { %v260_v60 = vadd.f32 %v259_v59, %v239_v58 }
 0x130   :  { %v165_v50 = vpop.f32.mrf.mxu2  ;;  %v263_v62 = vmul.f32 0.03125, %v260_v60 }
 0x131   :  { %v185_v51 = vpop.f32.mrf.mxu3 }
 0x132   :  { %v186_v52 = vadd.f32 %v185_v51, %v165_v50 }
 0x134   :  { %v262_v54 = vmul.f32 0.03125, %v186_v52 }
 0x136   :  { %v282_v55 = vmul.f32 %v321_v53, %v262_v54  ;;  %v264_v61 = vmul.f32 %v262_v54, %v262_v54 }
 0x138   :  { %284 = vrot.lane.b32.xlu0 %v282_v55, %s355_s27  ;;  %v265_v63 = vsub.f32 %v263_v62, %v264_v61 }
 0x13a   :  { %v266_v0 = vmax.f32 %v265_v63, 0.0 }
 0x13c   :  { %v267_v1 = vadd.f32 1e-05, %v266_v0 }
 0x13e   :  { %327 = vrsqrt.f32 %v267_v1  ;;  %vm274_vm3 = vweird.f32 %v267_v1 }
 0x144   :  { %v328_v2 = vpop.eup %327 }
 0x145   :  { %v269_v3 = vmul.f32 %v328_v2, %v267_v1  ;;  %vm275_vm2 = vweird.f32 %v328_v2 }
 0x146   :  { %vm276_vm4 = vmor %vm274_vm3, %vm275_vm2 }
 0x147   :  { %v270_v4 = vmul.f32 %v328_v2, %v269_v3 }
 0x149   :  { %v271_v5 = vmul.f32 0.5, %v270_v4 }
 0x14b   :  { %v272_v6 = vsub.f32 1.5, %v271_v5 }
 0x14d   :  { %v273_v7 = vmul.f32 %v328_v2, %v272_v6 }
 0x14f   :  { %v277_v10 = vsel %vm276_vm4, %v328_v2, %v273_v7 }
 0x1aa   :  { %v285_v56 = vpop.permute.xlu0 %284 }
 0x1ab   :  { %v287_v57 = vsub.f32 %v186_v52, %v285_v56 }
 0x1ad   :  { %289 = vrot.lane.b32.xlu0 %v287_v57, %s356_s28 }
 0x21f   :  { %v290_v9 = vpop.permute.xlu0 %289 }
 0x220   :  { %v292_v11 = vmul.f32 %v290_v9, %v277_v10 }
 0x222   :  { %v297_v12 = vadd.f32 %v322_v8, %v292_v11 }
 0x224   :  { %299 = vst.msk [vmem:[#allocation2] sm:$0xff] %vm298_vm5, %v297_v12 }
 0x225   :  { %310 = dma.vmem_to_hbm [thread:$0]  %s306_s8, 128, %s308_s11, [#allocation3]  }
 0x226   :  { %353 = dma.done.wait [#allocation3], 128  }
 0x227   :  { %354 = vsyncadd [#allocation3], 4294967168 }
 0x228   :  { %315 = vsyncpa [#allocation3], 1 }

</bundles_post_ra>
